<compile_context>
chip_gen: v7x
topology: tpu7x:2x2x1
jax: 0.10.0
libtpu: 0.0.40
codegen_flags: <defaults>
</compile_context>

<pallas_src>
import jax
import jax.numpy as jnp
from jax.experimental import pallas as pl
from jax.experimental.pallas import tpu as pltpu


_LANE = 128
# Conservative per-call VMEM budget: comfortably inside default scoped-VMEM on
# every generation (v5e 16 MiB, v6e 32 MiB, v7x 32 MiB of 64 MiB physical).
_VMEM_BUDGET = 12 * 1024 * 1024
# Keep W fully VMEM-resident when its (double-buffered) footprint is at most:
_RESIDENT_W_BYTES = 2 * 1024 * 1024


def _round_up(x, m):
    return ((x + m - 1) // m) * m


def _choose_tile(dim, preferred, align):
    """Largest multiple of `align` <= preferred that divides `dim`.
    `dim` is always a multiple of `align` here (padded), so `align` is a
    guaranteed fallback."""
    if dim <= preferred:
        return dim
    t = (preferred // align) * align
    while t > align and dim % t != 0:
        t -= align
    return t


# ---------------------------------------------------------------------------
# Kernels
# ---------------------------------------------------------------------------

def _mlp_fused_kernel(x_ref, w_ref, scale_ref, shift_ref, o_ref):
    """Whole contraction in one step (W resident or single-K tile).
    No accumulator scratch; epilogue fused directly."""
    out = jnp.dot(x_ref[...], w_ref[...], preferred_element_type=jnp.float32)
    out = out * scale_ref[...] + shift_ref[...]
    o_ref[...] = jnp.maximum(out, 0.0).astype(o_ref.dtype)


def _mlp_tiled_kernel(x_ref, w_ref, scale_ref, shift_ref, o_ref, acc_ref):
    """General K-tiled GEMM with f32 accumulator and fused scale/shift+ReLU."""
    k = pl.program_id(2)

    @pl.when(k == 0)
    def _():
        acc_ref[...] = jnp.zeros_like(acc_ref)

    acc_ref[...] += jnp.dot(x_ref[...], w_ref[...],
                            preferred_element_type=jnp.float32)

    @pl.when(k == pl.num_programs(2) - 1)
    def _():
        out = acc_ref[...] * scale_ref[...] + shift_ref[...]
        o_ref[...] = jnp.maximum(out, 0.0).astype(o_ref.dtype)


# ---------------------------------------------------------------------------
# Parameter preparation (do ONCE per parameter set, reuse across forwards)
# ---------------------------------------------------------------------------

def prepare_mlp_unit_params(weight, bias, bn_params=None, eps=1e-5,
                            compute_dtype=None):
    """Fold Linear bias (+ optional inference BatchNorm) into per-column
    (scale, shift), transpose W to (Din, Dout), cast (optionally) to the
    compute dtype, and pad Din/Dout up to multiples of 128 for lane-dense
    MXU/VMEM layout. Returns a dict consumed by `mlp_unit_forward_prepared`."""
    Dout, Din = weight.shape
    bias_f = bias.astype(jnp.float32)
    if bn_params is not None:
        gamma, beta, mean, var = (p.astype(jnp.float32) for p in bn_params)
        scale = gamma * jax.lax.rsqrt(var + eps)
        shift = (bias_f - mean) * scale + beta
    else:
        scale = jnp.ones((Dout,), jnp.float32)
        shift = bias_f

    w_t = weight.T  # (Din, Dout)
    if compute_dtype is not None:
        w_t = w_t.astype(compute_dtype)

    din_p = _round_up(Din, _LANE)
    dout_p = _round_up(Dout, _LANE)
    if (din_p, dout_p) != (Din, Dout):
        # Zero-padded rows of W contribute nothing to the contraction; padded
        # output columns get scale=1 / shift=0 and are sliced off afterwards.
        w_t = jnp.pad(w_t, ((0, din_p - Din), (0, dout_p - Dout)))
        scale = jnp.pad(scale, (0, dout_p - Dout), constant_values=1.0)
        shift = jnp.pad(shift, (0, dout_p - Dout))
    return dict(
        w_t=w_t,
        scale=scale.reshape(1, dout_p),
        shift=shift.reshape(1, dout_p),
        din=Din,
        dout=Dout,
        compute_dtype=compute_dtype,
    )


# ---------------------------------------------------------------------------
# Forward
# ---------------------------------------------------------------------------

def mlp_unit_forward_prepared(x, params, *, tb=None):
    """Inference forward given prepared params.  x: (B, Din)."""
    B, Din = x.shape
    assert Din == params["din"], "input feature dim mismatch"
    w_t, scale, shift = params["w_t"], params["scale"], params["shift"]
    dout = params["dout"]
    cdt = params["compute_dtype"]

    out_dtype = x.dtype
    if cdt is not None:
        x = x.astype(cdt)

    din_p, dout_p = w_t.shape
    in_isz = jnp.dtype(x.dtype).itemsize
    out_isz = jnp.dtype(out_dtype).itemsize
    sub_align = max(8, 32 // in_isz)        # 8 for f32, 16 for bf16

    # Pad contraction dim with zeros (contributes nothing to the matmul).
    if din_p != Din:
        x = jnp.pad(x, ((0, 0), (0, din_p - Din)))

    w_bytes = 2 * din_p * dout_p * jnp.dtype(w_t.dtype).itemsize  # double-buffered
    resident = w_bytes <= _RESIDENT_W_BYTES

    if resident:
        # ---- W-resident streaming path: 1-D grid over batch tiles only. ----
        if tb is None:
            per_row = 2 * (din_p * in_isz + dout_p * out_isz)  # X + O dbl-buffered
            tb_max = max(sub_align, (_VMEM_BUDGET - w_bytes) // per_row)
            tb = min(1024, _round_up(B, sub_align), tb_max)
            tb = max(sub_align, (tb // sub_align) * sub_align)
            # Keep >= 2 batch tiles when possible so v7x shards across both TCs.
            if _round_up(B, tb) // tb < 2 and B > 2 * sub_align:
                tb = max(sub_align, _round_up((B + 1) // 2, sub_align))
        b_p = _round_up(B, tb)
        if b_p != B:
            x = jnp.pad(x, ((0, b_p - B), (0, 0)))

        out = pl.pallas_call(
            _mlp_fused_kernel,
            out_shape=jax.ShapeDtypeStruct((b_p, dout_p), out_dtype),
            grid_spec=pltpu.PrefetchScalarGridSpec(
                num_scalar_prefetch=0,
                grid=(b_p // tb,),
                in_specs=[
                    pl.BlockSpec((tb, din_p), lambda i: (i, 0)),      # X tile
                    pl.BlockSpec((din_p, dout_p), lambda i: (0, 0)),  # W resident
                    pl.BlockSpec((1, dout_p), lambda i: (0, 0)),      # scale
                    pl.BlockSpec((1, dout_p), lambda i: (0, 0)),      # shift
                ],
                out_specs=pl.BlockSpec((tb, dout_p), lambda i: (i, 0)),
            ),
            compiler_params=pltpu.CompilerParams(
                dimension_semantics=("parallel",)),
        )(x, w_t, scale, shift)
    else:
        # ---- General tiled GEMM path for large layers. ----
        tn = _choose_tile(dout_p, 512, _LANE)
        tk = _choose_tile(din_p, 512, _LANE)
        if tb is None:
            tb = min(512, _round_up(B, sub_align))
            tb = max(sub_align, (tb // sub_align) * sub_align)
            if _round_up(B, tb) // tb < 2 and B > 2 * sub_align:
                tb = max(sub_align, _round_up((B + 1) // 2, sub_align))
        b_p = _round_up(B, tb)
        if b_p != B:
            x = jnp.pad(x, ((0, b_p - B), (0, 0)))

        grid = (b_p // tb, dout_p // tn, din_p // tk)
        single_k = grid[2] == 1
        kernel = _mlp_fused_kernel if single_k else _mlp_tiled_kernel
        scratch = [] if single_k else [pltpu.VMEM((tb, tn), jnp.float32)]

        out = pl.pallas_call(
            kernel,
            out_shape=jax.ShapeDtypeStruct((b_p, dout_p), out_dtype),
            grid_spec=pltpu.PrefetchScalarGridSpec(
                num_scalar_prefetch=0,
                grid=grid,
                in_specs=[
                    pl.BlockSpec((tb, tk), lambda i, j, k: (i, k)),   # X tile
                    pl.BlockSpec((tk, tn), lambda i, j, k: (k, j)),   # W tile
                    pl.BlockSpec((1, tn), lambda i, j, k: (0, j)),    # scale
                    pl.BlockSpec((1, tn), lambda i, j, k: (0, j)),    # shift
                ],
                out_specs=pl.BlockSpec((tb, tn), lambda i, j, k: (i, j)),
                scratch_shapes=scratch,
            ),
            compiler_params=pltpu.CompilerParams(
                dimension_semantics=("parallel", "parallel", "arbitrary")),
        )(x, w_t, scale, shift)

    if (b_p, dout_p) != (B, dout):
        out = out[:B, :dout]
    return out


def mlp_unit_forward(x, weight, bias, *, bn_params=None, eps=1e-5,
                     compute_dtype=None, tb=None):
    """Convenience wrapper (prepares params each call).  For inference loops,
    call `prepare_mlp_unit_params` once and reuse via
    `mlp_unit_forward_prepared`."""
    params = prepare_mlp_unit_params(weight, bias, bn_params=bn_params,
                                     eps=eps, compute_dtype=compute_dtype)
    return mlp_unit_forward_prepared(x, params, tb=tb)


def mlp_unit_reference(x, weight, bias, bn_params=None, eps=1e-5):
    out = jnp.dot(x.astype(jnp.float32), weight.astype(jnp.float32).T,
                  precision=jax.lax.Precision.HIGHEST) + bias.astype(jnp.float32)
    if bn_params is not None:
        gamma, beta, mean, var = (p.astype(jnp.float32) for p in bn_params)
        out = (out - mean) / jnp.sqrt(var + eps) * gamma + beta
    return jnp.maximum(out, 0.0)


if __name__ == "__main__":
    key = jax.random.PRNGKey(0)

    # --- small shapes consistent with MlpUnitLayer(batch=8, in=32, out=16) ---
    B, Din, Dout = 8, 32, 16
    k_x, k_w, k_m, k_v, key = jax.random.split(key, 5)
    x = jax.random.normal(k_x, (B, Din), dtype=jnp.float32)
    # xavier_normal_ init mirrored from the module; bias zeros.
    xavier_std = (2.0 / (Din + Dout)) ** 0.5
    weight = jax.random.normal(k_w, (Dout, Din), dtype=jnp.float32) * xavier_std
    bias = jnp.zeros((Dout,), dtype=jnp.float32)
    # batch_norm=True branch (inference): non-trivial running stats.
    gamma = jnp.ones((Dout,), jnp.float32)
    beta = jnp.zeros((Dout,), jnp.float32)
    run_mean = jax.random.normal(k_m, (Dout,), dtype=jnp.float32) * 0.1
    run_var = jax.random.uniform(k_v, (Dout,), dtype=jnp.float32,
                                 minval=0.5, maxval=1.5)
    bn = (gamma, beta, run_mean, run_var)

    params = prepare_mlp_unit_params(weight, bias, bn_params=bn)
    out = jax.block_until_ready(mlp_unit_forward_prepared(x, params))
    ref = mlp_unit_reference(x, weight, bias, bn_params=bn).astype(x.dtype)
    assert out.shape == (B, Dout)
    assert jnp.allclose(out, ref, atol=1e-4, rtol=1e-4), "small-shape mismatch"

    # --- W-resident streaming path with multiple batch tiles ---
    B2, Din2, Dout2 = 256, 256, 256
    k_x2, k_w2, key = jax.random.split(key, 3)
    x2 = jax.random.normal(k_x2, (B2, Din2), dtype=jnp.float32)
    w2 = jax.random.normal(k_w2, (Dout2, Din2), dtype=jnp.float32) \
        * (2.0 / (Din2 + Dout2)) ** 0.5
    b2 = jnp.zeros((Dout2,), dtype=jnp.float32)
    out2 = jax.block_until_ready(mlp_unit_forward(x2, w2, b2))
    ref2 = mlp_unit_reference(x2, w2, b2).astype(x2.dtype)
    assert jnp.allclose(out2, ref2, atol=1e-3, rtol=1e-3), "resident mismatch"

    # --- large layer: exercises the tiled GEMM path with K accumulation ---
    B3, Din3, Dout3 = 64, 768, 768
    k_x3, k_w3, key = jax.random.split(key, 3)
    x3 = jax.random.normal(k_x3, (B3, Din3), dtype=jnp.float32)
    w3 = jax.random.normal(k_w3, (Dout3, Din3), dtype=jnp.float32) \
        * (2.0 / (Din3 + Dout3)) ** 0.5
    b3 = jnp.full((Dout3,), 0.01, dtype=jnp.float32)
    out3 = jax.block_until_ready(mlp_unit_forward(x3, w3, b3))
    ref3 = mlp_unit_reference(x3, w3, b3).astype(x3.dtype)
    assert jnp.allclose(out3, ref3, atol=1e-3, rtol=1e-3), "tiled mismatch"

    # --- bf16 compute path (f32 accumulation, f32 output) ---
    out4 = jax.block_until_ready(
        mlp_unit_forward(x2, w2, b2, compute_dtype=jnp.bfloat16))
    assert out4.dtype == x2.dtype
    assert jnp.allclose(out4, ref2, atol=1e-1, rtol=1e-1), "bf16 mismatch"

    print("KERNEL_OK")
</pallas_src>

<mosaic_0001>
module attributes {stable_mosaic.version = 11 : i64} {
  func.func @_mlp_fused_kernel(%arg0: i32, %arg1: memref<8x128xf32, #tpu.memory_space<vmem>>, %arg2: memref<128x128xf32, #tpu.memory_space<vmem>>, %arg3: memref<1x128xf32, #tpu.memory_space<vmem>>, %arg4: memref<1x128xf32, #tpu.memory_space<vmem>>, %arg5: memref<8x128xf32, #tpu.memory_space<vmem>>) attributes {dimension_semantics = [#tpu.dimension_semantics<parallel>], iteration_bounds = array<i64: 1>, scalar_prefetch = 0 : i64, scratch_operands = 0 : i64, tpu.core_type = #tpu.core_type<tc>, window_params = [{transform_indices = @transform_0, window_bounds = array<i64: 8, 128>}, {pipeline_mode = #tpu.pipeline_mode<synchronous>, transform_indices = @transform_1, window_bounds = array<i64: 128, 128>}, {pipeline_mode = #tpu.pipeline_mode<synchronous>, transform_indices = @transform_2, window_bounds = array<i64: 1, 128>}, {pipeline_mode = #tpu.pipeline_mode<synchronous>, transform_indices = @transform_3, window_bounds = array<i64: 1, 128>}, {transform_indices = @transform_4, window_bounds = array<i64: 8, 128>}]} {
    %c0 = arith.constant 0 : index
    %c0_0 = arith.constant 0 : index
    %0 = vector.load %arg1[%c0, %c0_0] : memref<8x128xf32, #tpu.memory_space<vmem>>, vector<8x128xf32>
    %c0_1 = arith.constant 0 : index
    %c0_2 = arith.constant 0 : index
    %1 = vector.load %arg2[%c0_1, %c0_2] : memref<128x128xf32, #tpu.memory_space<vmem>>, vector<128x128xf32>
    %cst = arith.constant dense<0.000000e+00> : vector<8x128xf32>
    %2 = tpu.matmul %0, %1, %cst {dimension_numbers = #tpu.dot_dimension_numbers<[1], [0], [0], [1], [0, 0, 1, 1], [], []>} : vector<8x128xf32>, vector<128x128xf32>, vector<8x128xf32> -> vector<8x128xf32>
    %c0_3 = arith.constant 0 : index
    %c0_4 = arith.constant 0 : index
    %3 = vector.load %arg3[%c0_3, %c0_4] : memref<1x128xf32, #tpu.memory_space<vmem>>, vector<1x128xf32>
    %4 = vector.broadcast %3 : vector<1x128xf32> to vector<8x128xf32>
    %5 = arith.mulf %2, %4 : vector<8x128xf32>
    %c0_5 = arith.constant 0 : index
    %c0_6 = arith.constant 0 : index
    %6 = vector.load %arg4[%c0_5, %c0_6] : memref<1x128xf32, #tpu.memory_space<vmem>>, vector<1x128xf32>
    %7 = vector.broadcast %6 : vector<1x128xf32> to vector<8x128xf32>
    %8 = arith.addf %5, %7 : vector<8x128xf32>
    %cst_7 = arith.constant 0.000000e+00 : f32
    %9 = vector.broadcast %cst_7 : f32 to vector<8x128xf32>
    %10 = arith.maximumf %8, %9 : vector<8x128xf32>
    %c0_8 = arith.constant 0 : index
    %c0_9 = arith.constant 0 : index
    %11 = vector.load %arg5[%c0_8, %c0_9] : memref<8x128xf32, #tpu.memory_space<vmem>>, vector<8x128xf32>
    tpu.vector_store %arg5[%c0_8, %c0_9], %10 {strides = array<i32>} : memref<8x128xf32, #tpu.memory_space<vmem>>, vector<8x128xf32>,
    return
  }
  func.func @transform_0(%arg0: i32) -> (i32, i32) {
    %c0_i32 = arith.constant 0 : i32
    %c0_i32_0 = arith.constant 0 : i32
    return %arg0, %c0_i32 : i32, i32
  }
  func.func @transform_1(%arg0: i32) -> (i32, i32) {
    %c0_i32 = arith.constant 0 : i32
    %c0_i32_0 = arith.constant 0 : i32
    %c0_i32_1 = arith.constant 0 : i32
    return %c0_i32, %c0_i32_0 : i32, i32
  }
  func.func @transform_2(%arg0: i32) -> (i32, i32) {
    %c0_i32 = arith.constant 0 : i32
    %c0_i32_0 = arith.constant 0 : i32
    %c0_i32_1 = arith.constant 0 : i32
    return %c0_i32, %c0_i32_0 : i32, i32
  }
  func.func @transform_3(%arg0: i32) -> (i32, i32) {
    %c0_i32 = arith.constant 0 : i32
    %c0_i32_0 = arith.constant 0 : i32
    %c0_i32_1 = arith.constant 0 : i32
    return %c0_i32, %c0_i32_0 : i32, i32
  }
  func.func @transform_4(%arg0: i32) -> (i32, i32) {
    %c0_i32 = arith.constant 0 : i32
    %c0_i32_0 = arith.constant 0 : i32
    return %arg0, %c0_i32 : i32, i32
  }
}

</mosaic_0001>

<bundles_post_ra>
// kernel: tpu_custom_call.1
= control target key start
LH: loop header
LB: loop body
LE: loop exit
PB: predicated region body
PF: predicated region fallthrough
CT: control target
= control target key end

     0   :  { %9 = vsyncpa [#allocation3], 0  ;;  %s405_s0 = inlined_call_operand.hbm [shape: f32[8,128], index: 0, kind: input, shape index: {}]   ;;  %s406_s1 = inlined_call_operand.hbm [shape: f32[128,128], index: 1, kind: input, shape index: {}]   ;;  %s407_s2 = inlined_call_operand.vmem [shape: f32[1,128], index: 2, kind: input, shape index: {}]   ;;  %s408_s3 = inlined_call_operand.vmem [shape: f32[1,128], index: 3, kind: input, shape index: {}]   ;;  %s409_s4 = inlined_call_operand.hbm [shape: f32[8,128], index: 4, kind: output, shape index: {}]  }
   0x1   :  { %10 = vsyncpa [#allocation6], 0 }
   0x2   :  { %11 = vsyncpa [#allocation4], 0  ;;  %s323_s15 = smov [#allocation2]   ;;  %s324_s17 = smov [#allocation5]  }
   0x3   :  { %s18_s16 = sshll.u32 %s323_s15, 4  ;;  %s27_s18 = sshll.u32 %s324_s17, 4  ;;  %s19_s16 = int_to_ptr.vmem [resolvable:$true] %s18_s16  ;;  %s356_s18 = int_to_ptr.vmem [resolvable:$true] %s27_s18 }
   0x4   :  { %s251_s21 = scalar_lea.hbm %s405_s0, 128 }
   0x5   :  { %p252_p0 = scmp.ne.s32.totalorder %s405_s0, %s251_s21  ;;  %p255_p1 = scmp.lt.u32.totalorder %s251_s21, %s405_s0 }
   0x7   :  { %p257_p2 = pnand %p255_p1, %p252_p0 }
   0x9   :  { %260 = shalt.err (!%p257_p2)
}
   0xa   :  { %s261_s26 = scalar_lea.vmem %s19_s16, 128  ;;  %p266_p4 = scmp.lt.s32.totalorder %s19_s16, %s19_s16 }
   0xb   :  { %p262_p3 = scmp.ne.s32.totalorder %s19_s16, %s261_s26  ;;  %p267_p5 = scmp.lt.s32.totalorder %s261_s26, %s261_s26 }
   0xd   :  { %p268_p6 = por %p267_p5, %p266_p4 }
   0xf   :  { %p269_p7 = pnand %p268_p6, %p262_p3 }
  0x11   :  { %272 = shalt.err (!%p269_p7)
}
  0x12   :  { %21 = dma.hbm_to_vmem [thread:$0]  %s405_s0, 128, %s19_s16, [#allocation3]  }
  0x13   :  { %s273_s5 = scalar_lea.hbm %s406_s1, 2048 }
  0x14   :  { %p274_p8 = scmp.ne.s32.totalorder %s406_s1, %s273_s5  ;;  %p277_p9 = scmp.lt.u32.totalorder %s273_s5, %s406_s1 }
  0x16   :  { %p279_p10 = pnand %p277_p9, %p274_p8 }
  0x18   :  { %282 = shalt.err (!%p279_p10)
}
  0x19   :  { %s283_s10 = scalar_lea.vmem %s356_s18, 2048  ;;  %p288_p12 = scmp.lt.s32.totalorder %s356_s18, %s356_s18 }
  0x1a   :  { %p284_p11 = scmp.ne.s32.totalorder %s356_s18, %s283_s10  ;;  %p289_p13 = scmp.lt.s32.totalorder %s283_s10, %s283_s10 }
  0x1c   :  { %p290_p0 = por %p289_p13, %p288_p12 }
  0x1e   :  { %p291_p1 = pnand %p290_p0, %p284_p11 }
  0x20   :  { %294 = shalt.err (!%p291_p1)
}
  0x21   :  { %s325_s0 = smov 128   ;;  %s326_s11 = smov 8  }
  0x22   :  { %33 = dma.hbm_to_vmem [thread:$0]  %s406_s1, 2048, %s356_s18, [#allocation6], %s325_s0, %s325_s0, %s326_s11  }
  0x23   :  { %317 = dma.done.wait [#allocation3], 128  }
  0x24   :  { %318 = vsyncadd [#allocation3], 4294967168 }
  0x25   :  { %319 = dma.done.wait [#allocation6], 2048  }
  0x26   :  { %320 = vsyncadd [#allocation6], 4294965248  ;;  %v327_v0 = vmov 0.0|0.0   ;;  %vm328_vm0 = vmmov 0   ;;  %v329_v1 = vmov 0.0   ;;  %v45_v2 = vld [vmem:[#allocation5] sm:$0xff] }
  0x27   :  { %219 = vmatprep.subr.bf16.mxu0 %v327_v0  ;;  %216 = vmatprep.mubr.msk.f32.mxu0 %vm328_vm0, %v329_v1  ;;  %v46_v3 = vld [vmem:[#allocation5 + $0x8] sm:$0xff]  ;;  %v47_v4 = vld [vmem:[#allocation5 + $0x10] sm:$0xff]  ;;  %v48_v6 = vld [vmem:[#allocation5 + $0x18] sm:$0xff]  ;;  %s330_s17 = smov [#allocation7]  }
  0x28   :  { %v220_v5 = vpack.c.bf16 %v46_v3, %v45_v2  ;;  %v223_v7 = vpack.c.bf16 %v48_v6, %v47_v4  ;;  %v49_v8 = vld [vmem:[#allocation5 + $0x20] sm:$0xff]  ;;  %v50_v9 = vld [vmem:[#allocation5 + $0x28] sm:$0xff]  ;;  %v51_v11 = vld [vmem:[#allocation5 + $0x30] sm:$0xff]  ;;  %s155_s18 = sshll.u32 %s330_s17, 4  ;;  %s156_s18 = int_to_ptr.vmem [resolvable:$true] %s155_s18 }
  0x29   :  { %v226_v10 = vpack.c.bf16 %v50_v9, %v49_v8  ;;  %v52_v12 = vld [vmem:[#allocation5 + $0x38] sm:$0xff]  ;;  %v53_v14 = vld [vmem:[#allocation5 + $0x40] sm:$0xff]  ;;  %v54_v15 = vld [vmem:[#allocation5 + $0x48] sm:$0xff]  ;;  %s295_s19 = scalar_lea.vmem %s156_s18, 128  ;;  %p300_p3 = scmp.lt.s32.totalorder %s156_s18, %s156_s18 }
  0x2a   :  { %221 = vmatpush3.bf16.msra.mxu0 %v220_v5  ;;  %v229_v13 = vpack.c.bf16 %v52_v12, %v51_v11  ;;  %v232_v16 = vpack.c.bf16 %v54_v15, %v53_v14  ;;  %v55_v17 = vld [vmem:[#allocation5 + $0x50] sm:$0xff]  ;;  %v56_v18 = vld [vmem:[#allocation5 + $0x58] sm:$0xff]  ;;  %v57_v20 = vld [vmem:[#allocation5 + $0x60] sm:$0xff]  ;;  %p296_p2 = scmp.ne.s32.totalorder %s156_s18, %s295_s19  ;;  %p301_p4 = scmp.lt.s32.totalorder %s295_s19, %s295_s19 }
  0x2b   :  { %222 = vmatprep.subr.bf16.mxu0 %v327_v0  ;;  %v235_v19 = vpack.c.bf16 %v56_v18, %v55_v17  ;;  %v58_v21 = vld [vmem:[#allocation5 + $0x68] sm:$0xff]  ;;  %v59_v23 = vld [vmem:[#allocation5 + $0x70] sm:$0xff]  ;;  %v60_v24 = vld [vmem:[#allocation5 + $0x78] sm:$0xff] }
  0x2c   :  { %v238_v22 = vpack.c.bf16 %v58_v21, %v57_v20  ;;  %v241_v25 = vpack.c.bf16 %v60_v24, %v59_v23  ;;  %v44_v26 = vld [vmem:[#allocation2] sm:$0xff]  ;;  %p302_p5 = por %p301_p4, %p300_p3 }
  0x2d   :  { %v165_v27 = vld [vmem:[%s407_s2] ss:$0 sm:$0xff] }
  0x2e   :  { %224 = vmatpush3.bf16.msra.mxu0 %v223_v7  ;;  %v166_v29 = vld [vmem:[%s408_s3] ss:$0 sm:$0xff]  ;;  %p303_p6 = pnand %p302_p5, %p296_p2 }
  0x2f   :  { %225 = vmatprep.subr.bf16.mxu0 %v327_v0 }
  0x32   :  { %227 = vmatpush3.bf16.msra.mxu0 %v226_v10 }
  0x33   :  { %228 = vmatprep.subr.bf16.mxu0 %v327_v0 }
  0x36   :  { %230 = vmatpush3.bf16.msra.mxu0 %v229_v13 }
  0x37   :  { %231 = vmatprep.subr.bf16.mxu0 %v327_v0 }
  0x3a   :  { %233 = vmatpush3.bf16.msra.mxu0 %v232_v16 }
  0x3b   :  { %234 = vmatprep.subr.bf16.mxu0 %v327_v0 }
  0x3e   :  { %236 = vmatpush3.bf16.msra.mxu0 %v235_v19 }
  0x3f   :  { %237 = vmatprep.subr.bf16.mxu0 %v327_v0 }
  0x42   :  { %239 = vmatpush3.bf16.msra.mxu0 %v238_v22 }
  0x43   :  { %240 = vmatprep.subr.bf16.mxu0 %v327_v0 }
  0x46   :  { %242 = vmatpush3.bf16.msra.mxu0 %v241_v25 }
  0x49   :  { %217 = vmatmul.mubr.f32.vlgmr.msra.gmra.mrb[0].mxu0 %v44_v26 }
 0x11c   :  { %v127_v28 = vpop.f32.mrb[0].mxu0 }
 0x11d   :  { %v138_v30 = vmul.f32 %v165_v27, %v127_v28  ;;  %v218_v31 = vpop.f32.mrb[1].mxu0 }
 0x11f   :  { %v146_v32 = vadd.f32 %v166_v29, %v138_v30 }
 0x121   :  { %v147_v33 = vmax.f32 %v146_v32, 0.0 }
 0x123   :  { %148 = vst [vmem:[#allocation7] sm:$0xff] %v147_v33 }
 0x124   :  { %306 = shalt.err (!%p303_p6)
}
 0x125   :  { %s307_s21 = scalar_lea.hbm %s409_s4, 128 }
 0x126   :  { %p308_p7 = scmp.ne.s32.totalorder %s409_s4, %s307_s21  ;;  %p311_p8 = scmp.lt.u32.totalorder %s307_s21, %s409_s4 }
 0x128   :  { %p313_p9 = pnand %p311_p8, %p308_p7 }
 0x12a   :  { %316 = shalt.err (!%p313_p9)
}
 0x12b   :  { %158 = dma.vmem_to_hbm [thread:$0]  %s156_s18, 128, %s409_s4, [#allocation4]  }
 0x12c   :  { %321 = dma.done.wait [#allocation4], 128  }
 0x12d   :  { %322 = vsyncadd [#allocation4], 4294967168 }
 0x12e   :  { %162 = vsyncpa [#allocation3], 1 }
 0x12f   :  { %163 = vsyncpa [#allocation6], 1 }
 0x130   :  { %164 = vsyncpa [#allocation4], 1 }

</bundles_post_ra>
